<compile_context>
chip_gen: v6e
topology: v6e:2x2x1
jax: 0.10.0
libtpu: 0.0.40
codegen_flags: <defaults>
</compile_context>

<pallas_src>
import functools
import math

import jax
import jax.numpy as jnp
from jax import lax
from jax.experimental import pallas as pl
from jax.experimental.pallas import tpu as pltpu

_NEG_INF = -1e30  # large finite negative; avoids exp(-inf - -inf) = NaN pitfalls


# ----------------------------------------------------------------------------
# Helpers
# ----------------------------------------------------------------------------
def _sublane(dtype):
    """Minimum second-to-last tile multiple for a storage dtype (8 f32, 16 bf16, 32 i8)."""
    return max(8, 32 // jnp.dtype(dtype).itemsize)


def _pick_tile(dim, pref, align):
    """Largest tile <= pref, multiple of `align`, dividing `dim`; else full (small) dim."""
    if dim <= pref:
        return dim
    t = (pref // align) * align
    while t >= align:
        if dim % t == 0:
            return t
        t -= align
    if dim <= 4096:
        return dim
    # TODO(synk): pad-and-mask tiling for huge dims with no aligned divisor.
    raise ValueError(f"no aligned tile for dim={dim} (align={align}); pad the input")


def _vmem_capacity():
    try:
        return int(pltpu.get_tpu_info().vmem_capacity_bytes)
    except Exception:
        return 128 << 20


def _vmem_limit(nbytes):
    """Scoped-VMEM budget: >= 32 MiB, capped at 3/4 of physical VMEM (headroom)."""
    ceiling = (_vmem_capacity() // 4) * 3
    return int(min(max(int(1.5 * nbytes), 32 << 20), ceiling))


def _gemm_tile_defaults():
    """Per-generation GEMM row-panel defaults (bigger tm where VMEM allows)."""
    if _vmem_capacity() <= (64 << 20):   # v7x-class: halved VMEM -> moderate tm + N tiling
        return 512, 512, 512
    return 768, 512, 512                 # v5e / v6e (v6e ridge ~650 flop/byte)


def _dot_precision(compute_dtype):
    """f32 operands: force accurate multi-pass MXU; bf16 is single-pass anyway."""
    if jnp.dtype(compute_dtype) == jnp.dtype(jnp.float32):
        return lax.Precision.HIGHEST
    return lax.Precision.DEFAULT


# ----------------------------------------------------------------------------
# Stacked tiled linear: (M, K) @ (S, K, N) + (S, 1, N) -> (S, M, N)
#   S = 3 for the fused QKV projection, S = 1 for the output projection.
# ----------------------------------------------------------------------------
def _stacked_linear_kernel(x_ref, w_ref, b_ref, o_ref, acc_ref, *, compute_dtype):
    k = pl.program_id(3)

    @pl.when(k == 0)
    def _():
        acc_ref[...] = jnp.zeros_like(acc_ref)

    acc_ref[...] += jnp.dot(
        x_ref[...].astype(compute_dtype),
        w_ref[0].astype(compute_dtype),
        preferred_element_type=jnp.float32,
        precision=_dot_precision(compute_dtype),
    )

    @pl.when(k == pl.num_programs(3) - 1)
    def _():
        o_ref[0] = (acc_ref[...] + b_ref[0]).astype(o_ref.dtype)


def _stacked_linear(x2d, w_stack, b_stack, *, tm, tn, tk, compute_dtype, out_dtype):
    M, K = x2d.shape
    S, K2, N = w_stack.shape
    assert K == K2
    sub = max(_sublane(x2d.dtype), _sublane(out_dtype))
    tm = _pick_tile(M, tm, sub)
    tn = _pick_tile(N, tn, 128)
    tk = _pick_tile(K, tk, 128)
    grid = (S, M // tm, N // tn, K // tk)

    it_x = jnp.dtype(x2d.dtype).itemsize
    it_w = jnp.dtype(w_stack.dtype).itemsize
    it_o = jnp.dtype(out_dtype).itemsize
    vmem = (2 * (tm * tk * it_x + tk * tn * it_w + tn * it_w)
            + 2 * tm * tn * it_o + tm * tn * 4)

    return pl.pallas_call(
        functools.partial(_stacked_linear_kernel, compute_dtype=compute_dtype),
        out_shape=jax.ShapeDtypeStruct((S, M, N), out_dtype),
        grid=grid,
        in_specs=[
            pl.BlockSpec((tm, tk), lambda s, i, j, k: (i, k)),
            pl.BlockSpec((1, tk, tn), lambda s, i, j, k: (s, k, j)),
            pl.BlockSpec((1, 1, tn), lambda s, i, j, k: (s, 0, j)),
        ],
        out_specs=pl.BlockSpec((1, tm, tn), lambda s, i, j, k: (s, i, j)),
        scratch_shapes=[pltpu.VMEM((tm, tn), jnp.float32)],
        compiler_params=pltpu.CompilerParams(
            dimension_semantics=("parallel", "parallel", "parallel", "arbitrary"),
            vmem_limit_bytes=_vmem_limit(vmem),
        ),
    )(x2d, w_stack, b_stack)


# ----------------------------------------------------------------------------
# Flash-style causal attention, heads packed on the lane axis,
# lower-triangular flattened schedule via scalar prefetch.
# ----------------------------------------------------------------------------
def _flash_attn_kernel(qi_ref, ki_ref, q_ref, k_ref, v_ref, o_ref,
                       m_ref, l_ref, acc_ref,
                       *, n_head, blk_q, blk_k, compute_dtype, exp_dtype):
    t = pl.program_id(1)
    qi = qi_ref[t]
    ki = ki_ref[t]
    C = q_ref.shape[-1]
    hd = C // n_head
    scale = 1.0 / math.sqrt(hd)
    prec = _dot_precision(compute_dtype)

    q_start = qi * blk_q
    k_start = ki * blk_k
    last_ki = (q_start + blk_q - 1) // blk_k   # last kv block intersecting causal band

    @pl.when(ki == 0)
    def _():
        m_ref[...] = jnp.full_like(m_ref, _NEG_INF)
        l_ref[...] = jnp.zeros_like(l_ref)
        acc_ref[...] = jnp.zeros_like(acc_ref)

    def step(apply_mask):
        q_blk = q_ref[0, 0]  # (blk_q, C)
        k_blk = k_ref[0, 0]  # (blk_k, C)
        v_blk = v_ref[0, 0]  # (blk_k, C)
        if apply_mask:
            # Global-index mask (blk_q and blk_k may differ).
            row = q_start + lax.broadcasted_iota(jnp.int32, (blk_q, blk_k), 0)
            col = k_start + lax.broadcasted_iota(jnp.int32, (blk_q, blk_k), 1)
            keep = row >= col
        alphas, pvs = [], []
        # Static head loop: per-head (blk_q, blk_k) tiles die each iteration; only
        # (blk_q, hd) pieces (bounded by blk_q*C) stay live until the concat below.
        # TODO(synk): lax.fori_loop over aligned head pairs for very large n_head.
        for h in range(n_head):
            lo, hi = h * hd, (h + 1) * hd
            # Fold 1/sqrt(hd) into q once (blk_q*hd muls instead of blk_q*blk_k).
            q_h = (q_blk[:, lo:hi] * scale).astype(compute_dtype)
            k_h = k_blk[:, lo:hi].astype(compute_dtype)
            v_h = v_blk[:, lo:hi].astype(compute_dtype)
            # q @ k^T without materializing the transpose (contract last dims).
            s = lax.dot_general(q_h, k_h, (((1,), (1,)), ((), ())),
                                preferred_element_type=jnp.float32,
                                precision=prec)
            if apply_mask:
                s = jnp.where(keep, s, _NEG_INF)
            m_prev = m_ref[h]                       # (blk_q, 1) f32
            l_prev = l_ref[h]
            m_new = jnp.maximum(m_prev, jnp.max(s, axis=-1, keepdims=True))
            alpha = jnp.exp(m_prev - m_new)         # f32
            p = jnp.exp((s - m_new).astype(exp_dtype))   # bf16 exp on v6e/v7x if requested
            l_ref[h] = alpha * l_prev + jnp.sum(p.astype(jnp.float32),
                                                axis=-1, keepdims=True)
            m_ref[h] = m_new
            pv = jnp.dot(p.astype(compute_dtype), v_h,
                         preferred_element_type=jnp.float32, precision=prec)
            alphas.append(jnp.broadcast_to(alpha, (blk_q, hd)))
            pvs.append(pv)
        alpha_full = jnp.concatenate(alphas, axis=-1)   # (blk_q, C)
        pv_full = jnp.concatenate(pvs, axis=-1)         # (blk_q, C)
        # Single full-width, lane-dense accumulator read-modify-write per kv step.
        acc_ref[...] = alpha_full * acc_ref[...] + pv_full

    # Blocks fully below the diagonal need no mask; diagonal-overlapping blocks do.
    @pl.when(k_start + (blk_k - 1) <= q_start)
    def _():
        step(apply_mask=False)

    @pl.when(k_start + (blk_k - 1) > q_start)
    def _():
        step(apply_mask=True)

    @pl.when(ki == last_ki)
    def _():
        invs = []
        for h in range(n_head):
            inv = pl.reciprocal(l_ref[h], approx=False)   # exact, once per q block
            invs.append(jnp.broadcast_to(inv, (blk_q, hd)))
        inv_full = jnp.concatenate(invs, axis=-1)
        # Single lane-dense (blk_q, C) store in the final (B, T, C) layout.
        o_ref[0] = (acc_ref[...] * inv_full).astype(o_ref.dtype)


def _attention(qkv3, n_head, *, blk_q, blk_k, compute_dtype, exp_dtype, out_dtype):
    three, B, T, C = qkv3.shape
    assert three == 3 and C % n_head == 0

    sub = max(_sublane(qkv3.dtype), _sublane(out_dtype))
    blk_q = _pick_tile(T, blk_q, sub)
    blk_k = _pick_tile(T, blk_k, sub)
    n_q = T // blk_q

    # Flattened lower-triangular (q_block, kv_block) schedule: causally dead blocks
    # never appear in the grid -> no DMA and no grid-step overhead for them.
    qi_l, ki_l = [], []
    for qi in range(n_q):
        last_ki = (qi * blk_q + blk_q - 1) // blk_k
        for ki in range(last_ki + 1):
            qi_l.append(qi)
            ki_l.append(ki)
    qi_tbl = jnp.asarray(qi_l, dtype=jnp.int32)
    ki_tbl = jnp.asarray(ki_l, dtype=jnp.int32)
    n_steps = len(qi_l)

    it_q = jnp.dtype(qkv3.dtype).itemsize
    it_o = jnp.dtype(out_dtype).itemsize
    vmem = (2 * (blk_q + 2 * blk_k) * C * it_q   # double-buffered q / k / v blocks
            + 2 * blk_q * C * it_o               # output block
            + blk_q * C * 4                      # f32 accumulator
            + 2 * n_head * blk_q * 128 * 4)      # m / l stats (lane-padded)

    kern = functools.partial(
        _flash_attn_kernel, n_head=n_head, blk_q=blk_q, blk_k=blk_k,
        compute_dtype=compute_dtype, exp_dtype=exp_dtype)

    return pl.pallas_call(
        kern,
        out_shape=jax.ShapeDtypeStruct((B, T, C), out_dtype),
        grid_spec=pltpu.PrefetchScalarGridSpec(
            num_scalar_prefetch=2,
            grid=(B, n_steps),   # megacore shards on B (balanced; q-work is skewed)
            in_specs=[
                pl.BlockSpec((1, 1, blk_q, C), lambda b, t, qi, ki: (0, b, qi[t], 0)),
                pl.BlockSpec((1, 1, blk_k, C), lambda b, t, qi, ki: (1, b, ki[t], 0)),
                pl.BlockSpec((1, 1, blk_k, C), lambda b, t, qi, ki: (2, b, ki[t], 0)),
            ],
            out_specs=pl.BlockSpec((1, blk_q, C), lambda b, t, qi, ki: (b, qi[t], 0)),
            scratch_shapes=[
                pltpu.VMEM((n_head, blk_q, 1), jnp.float32),   # running max
                pltpu.VMEM((n_head, blk_q, 1), jnp.float32),   # running sum
                pltpu.VMEM((blk_q, C), jnp.float32),           # output accumulator
            ],
        ),
        compiler_params=pltpu.CompilerParams(
            dimension_semantics=("parallel", "arbitrary"),
            vmem_limit_bytes=_vmem_limit(vmem),
        ),
    )(qi_tbl, ki_tbl, qkv3, qkv3, qkv3)


# ----------------------------------------------------------------------------
# Module forward
# ----------------------------------------------------------------------------
def prepare_params(raw, dtype=None):
    """Pre-transpose / stack the nn.Linear weights once, outside the hot path.

    If `dtype` is given (e.g. bf16) weights are stored in that dtype (halves weight
    DMA); biases stay in their original dtype (added post-accumulation in f32).
    """
    w_qkv = jnp.stack([raw["query_w"].T, raw["key_w"].T, raw["value_w"].T], axis=0)
    b_qkv = jnp.stack([raw["query_b"], raw["key_b"], raw["value_b"]], axis=0)[:, None, :]
    w_proj = raw["proj_w"].T[None]          # (1, C, C) in (in, out) layout
    b_proj = raw["proj_b"][None, None, :]   # (1, 1, C)
    if dtype is not None:
        w_qkv = w_qkv.astype(dtype)
        w_proj = w_proj.astype(dtype)
    return {"w_qkv": w_qkv, "b_qkv": b_qkv, "w_proj": w_proj, "b_proj": b_proj}


def self_attention_forward(x, prepared, n_head, *, compute_dtype=jnp.bfloat16,
                           softmax_exp_dtype=jnp.float32, blk_q=128, blk_k=256):
    """Forward pass of SelfAttention (eval mode).

    compute_dtype: MXU operand dtype (default bf16 for v5e/v6e/v7x peak throughput;
        accumulators and softmax stats always stay f32).
    softmax_exp_dtype: pass jnp.bfloat16 on v6e/v7x to relieve the EUP for small
        head_dim (keep f32 on v5e — no bf16 EUP there).
    """
    B, T, C = x.shape
    cdt = jnp.dtype(compute_dtype)
    x_dt = jnp.dtype(x.dtype)
    # Intermediates (qkv, attention output) stored in the narrower dtype.
    inter_dtype = cdt if cdt.itemsize < x_dt.itemsize else x_dt
    tm, tn, tk = _gemm_tile_defaults()

    x2d = x.reshape(B * T, C)
    qkv = _stacked_linear(x2d, prepared["w_qkv"], prepared["b_qkv"],
                          tm=tm, tn=tn, tk=tk, compute_dtype=cdt,
                          out_dtype=inter_dtype)                # (3, B*T, C)
    qkv3 = qkv.reshape(3, B, T, C)                              # free reshape
    attn = _attention(qkv3, n_head, blk_q=blk_q, blk_k=blk_k,
                      compute_dtype=cdt, exp_dtype=jnp.dtype(softmax_exp_dtype),
                      out_dtype=inter_dtype)                    # (B, T, C)
    y = _stacked_linear(attn.reshape(B * T, C), prepared["w_proj"], prepared["b_proj"],
                        tm=tm, tn=tn, tk=tk, compute_dtype=cdt,
                        out_dtype=x_dt)                         # (1, B*T, C)
    # TODO(synk): nn.Dropout in training mode not implemented (eval-mode identity).
    return y.reshape(B, T, C)


# ----------------------------------------------------------------------------
# Reference (pure jnp) for sanity checking
# ----------------------------------------------------------------------------
def _reference(x, raw, n_head):
    B, T, C = x.shape
    hd = C // n_head

    def lin(t, w, b):
        return t @ w.T + b

    with jax.default_matmul_precision("highest"):
        k = lin(x, raw["key_w"], raw["key_b"]).reshape(B, T, n_head, hd).transpose(0, 2, 1, 3)
        q = lin(x, raw["query_w"], raw["query_b"]).reshape(B, T, n_head, hd).transpose(0, 2, 1, 3)
        v = lin(x, raw["value_w"], raw["value_b"]).reshape(B, T, n_head, hd).transpose(0, 2, 1, 3)
        att = (q @ k.transpose(0, 1, 3, 2)) / math.sqrt(hd)
        mask = jnp.tril(jnp.ones((T, T)))[None, None]
        att = jnp.where(mask == 0, -jnp.inf, att)
        att = jax.nn.softmax(att, axis=-1)
        out = (att @ v).transpose(0, 2, 1, 3).reshape(B, T, C)
        return lin(out, raw["proj_w"], raw["proj_b"])


# ----------------------------------------------------------------------------
# Main
# ----------------------------------------------------------------------------
if __name__ == "__main__":
    B, T, C, n_head = 2, 8, 32, 4

    key = jax.random.PRNGKey(0)
    ks = jax.random.split(key, 9)

    def init_w(k):
        return jax.random.normal(k, (C, C), dtype=jnp.float32) * 0.02

    def init_b(k):
        return jax.random.normal(k, (C,), dtype=jnp.float32) * 0.02

    raw_params = {
        "key_w": init_w(ks[0]),   "key_b": init_b(ks[4]),
        "query_w": init_w(ks[1]), "query_b": init_b(ks[5]),
        "value_w": init_w(ks[2]), "value_b": init_b(ks[6]),
        "proj_w": init_w(ks[3]),  "proj_b": init_b(ks[7]),
    }
    x = jax.random.normal(ks[8], (B, T, C), dtype=jnp.float32)
    y_ref = _reference(x, raw_params, n_head)

    # 1) Exact-precision path (f32 MXU operands) — strict check vs jnp reference.
    y32 = jax.block_until_ready(
        self_attention_forward(x, prepare_params(raw_params), n_head,
                               compute_dtype=jnp.float32))
    assert y32.shape == (B, T, C)
    assert jnp.allclose(y32, y_ref, atol=1e-4, rtol=1e-4), "f32 mismatch vs reference"

    # 2) Production path (default): bf16 MXU operands + bf16 intermediates/weights.
    y16 = jax.block_until_ready(
        self_attention_forward(x, prepare_params(raw_params, dtype=jnp.bfloat16), n_head))
    assert y16.shape == (B, T, C)
    assert jnp.allclose(y16.astype(jnp.float32), y_ref, atol=3e-2, rtol=3e-2), \
        "bf16 mismatch vs reference"

    print("KERNEL_OK")
</pallas_src>

<mosaic_0001>
module attributes {stable_mosaic.version = 11 : i64} {
  func.func @_stacked_linear_kernel(%arg0: i32, %arg1: i32, %arg2: i32, %arg3: i32, %arg4: memref<16x32xf32, #tpu.memory_space<vmem>>, %arg5: memref<1x32x32xf32, #tpu.memory_space<vmem>>, %arg6: memref<1x1x32xf32, #tpu.memory_space<vmem>>, %arg7: memref<1x16x32xf32, #tpu.memory_space<vmem>>, %arg8: memref<16x32xf32, #tpu.memory_space<vmem>>) attributes {dimension_semantics = [#tpu.dimension_semantics<parallel>, #tpu.dimension_semantics<parallel>, #tpu.dimension_semantics<parallel>, #tpu.dimension_semantics<arbitrary>], iteration_bounds = array<i64: 3, 1, 1, 1>, scalar_prefetch = 0 : i64, scratch_operands = 1 : i64, tpu.core_type = #tpu.core_type<tc>, window_params = [{transform_indices = @transform_0, window_bounds = array<i64: 16, 32>}, {transform_indices = @transform_1, window_bounds = array<i64: 1, 32, 32>}, {transform_indices = @transform_2, window_bounds = array<i64: 1, 1, 32>}, {transform_indices = @transform_3, window_bounds = array<i64: 1, 16, 32>}]} {
    %c0_i32 = arith.constant 0 : i32
    %0 = arith.cmpi eq, %arg3, %c0_i32 : i32
    %1 = arith.extui %0 : i1 to i32
    %c0_i32_0 = arith.constant 0 : i32
    %2 = arith.cmpi ne, %1, %c0_i32_0 : i32
    scf.if %2 {
      %cst_11 = arith.constant 0.000000e+00 : f32
      %13 = vector.broadcast %cst_11 : f32 to vector<16x32xf32>
      %c0_12 = arith.constant 0 : index
      %c0_13 = arith.constant 0 : index
      %14 = vector.load %arg8[%c0_12, %c0_13] : memref<16x32xf32, #tpu.memory_space<vmem>>, vector<16x32xf32>
      tpu.vector_store %arg8[%c0_12, %c0_13], %13 {strides = array<i32>} : memref<16x32xf32, #tpu.memory_space<vmem>>, vector<16x32xf32>,
    } else {
    }
    %c0 = arith.constant 0 : index
    %c0_1 = arith.constant 0 : index
    %3 = vector.load %arg8[%c0, %c0_1] : memref<16x32xf32, #tpu.memory_space<vmem>>, vector<16x32xf32>
    %c0_2 = arith.constant 0 : index
    %c0_3 = arith.constant 0 : index
    %4 = vector.load %arg4[%c0_2, %c0_3] : memref<16x32xf32, #tpu.memory_space<vmem>>, vector<16x32xf32>
    %c0_4 = arith.constant 0 : index
    %c0_5 = arith.constant 0 : index
    %c0_6 = arith.constant 0 : index
    %5 = vector.load %arg5[%c0_4, %c0_5, %c0_6] : memref<1x32x32xf32, #tpu.memory_space<vmem>>, vector<1x32x32xf32>
    %6 = vector.shape_cast %5 : vector<1x32x32xf32> to vector<32x32xf32>
    %cst = arith.constant dense<0.000000e+00> : vector<16x32xf32>
    %7 = tpu.matmul %4, %6, %cst {dimension_numbers = #tpu.dot_dimension_numbers<[1], [0], [0], [1], [0, 0, 1, 1], [], []>, precision = #tpu.contract_precision<fp32>} : vector<16x32xf32>, vector<32x32xf32>, vector<16x32xf32> -> vector<16x32xf32>
    %8 = arith.addf %3, %7 : vector<16x32xf32>
    %c0_7 = arith.constant 0 : index
    %c0_8 = arith.constant 0 : index
    %9 = vector.load %arg8[%c0_7, %c0_8] : memref<16x32xf32, #tpu.memory_space<vmem>>, vector<16x32xf32>
    tpu.vector_store %arg8[%c0_7, %c0_8], %8 {strides = array<i32>} : memref<16x32xf32, #tpu.memory_space<vmem>>, vector<16x32xf32>,
    %c0_i32_9 = arith.constant 0 : i32
    %10 = arith.cmpi eq, %arg3, %c0_i32_9 : i32
    %11 = arith.extui %10 : i1 to i32
    %c0_i32_10 = arith.constant 0 : i32
    %12 = arith.cmpi ne, %11, %c0_i32_10 : i32
    scf.if %12 {
      %c0_11 = arith.constant 0 : index
      %c0_12 = arith.constant 0 : index
      %13 = vector.load %arg8[%c0_11, %c0_12] : memref<16x32xf32, #tpu.memory_space<vmem>>, vector<16x32xf32>
      %c0_13 = arith.constant 0 : index
      %c0_14 = arith.constant 0 : index
      %c0_15 = arith.constant 0 : index
      %14 = vector.load %arg6[%c0_13, %c0_14, %c0_15] : memref<1x1x32xf32, #tpu.memory_space<vmem>>, vector<1x1x32xf32>
      %15 = vector.shape_cast %14 : vector<1x1x32xf32> to vector<1x32xf32>
      %16 = vector.broadcast %15 : vector<1x32xf32> to vector<16x32xf32>
      %17 = arith.addf %13, %16 : vector<16x32xf32>
      %c0_16 = arith.constant 0 : index
      %c0_17 = arith.constant 0 : index
      %c0_18 = arith.constant 0 : index
      %18 = vector.load %arg7[%c0_16, %c0_17, %c0_18] : memref<1x16x32xf32, #tpu.memory_space<vmem>>, vector<1x16x32xf32>
      %19 = vector.shape_cast %18 : vector<1x16x32xf32> to vector<16x32xf32>
      %20 = vector.shape_cast %17 : vector<16x32xf32> to vector<1x16x32xf32>
      tpu.vector_store %arg7[%c0_16, %c0_17, %c0_18], %20 {strides = array<i32>} : memref<1x16x32xf32, #tpu.memory_space<vmem>>, vector<1x16x32xf32>,
    } else {
    }
    return
  }
  func.func @transform_0(%arg0: i32, %arg1: i32, %arg2: i32, %arg3: i32) -> (i32, i32) {
    %c0_i32 = arith.constant 0 : i32
    return %arg1, %arg3 : i32, i32
  }
  func.func @transform_1(%arg0: i32, %arg1: i32, %arg2: i32, %arg3: i32) -> (i32, i32, i32) {
    %c0_i32 = arith.constant 0 : i32
    return %arg0, %arg3, %arg2 : i32, i32, i32
  }
  func.func @transform_2(%arg0: i32, %arg1: i32, %arg2: i32, %arg3: i32) -> (i32, i32, i32) {
    %c0_i32 = arith.constant 0 : i32
    %c0_i32_0 = arith.constant 0 : i32
    return %arg0, %c0_i32, %arg2 : i32, i32, i32
  }
  func.func @transform_3(%arg0: i32, %arg1: i32, %arg2: i32, %arg3: i32) -> (i32, i32, i32) {
    %c0_i32 = arith.constant 0 : i32
    return %arg0, %arg1, %arg2 : i32, i32, i32
  }
}

</mosaic_0001>

<bundles_post_ra>
// kernel: tpu_custom_call.1
= control target key start
LH: loop header
LB: loop body
LE: loop exit
PB: predicated region body
PF: predicated region fallthrough
CT: control target
= control target key end

     0   :  { %8 = vsyncpa [#allocation4], 0  ;;  %s1605_s0 = inlined_call_operand.hbm [shape: f32[16,32], index: 0, kind: input, shape index: {}]   ;;  %s1606_s1 = inlined_call_operand.hbm [shape: f32[3,32,32], index: 1, kind: input, shape index: {}]   ;;  %s1607_s2 = inlined_call_operand.vmem [shape: f32[3,1,32], index: 2, kind: input, shape index: {}]   ;;  %s1608_s3 = inlined_call_operand.hbm [shape: f32[3,16,32], index: 3, kind: output, shape index: {}]  }
   0x1   :  { %9 = vsyncpa [#allocation7], 0 }
   0x2   :  { %11 = vsyncpa [#allocation7 + $0x1], 0 }
   0x3   :  { %12 = vsyncpa [#allocation5], 0 }
   0x4   :  { %14 = vsyncpa [#allocation5 + $0x1], 0  ;;  %s1358_s12 = smov 0   ;;  %s1360_s13 = smov 0  }
   0x5   :  { %s1362_s14 = smov 0   ;;  %s1364_s15 = smov 0  }
   0x6   :  { %s1366_s16 = smov 0   ;;  %s1368_s17 = smov 0  }
   0x7 LB: > { %s990_s18 = sadd.s32 4294967295, %s1328_s17   ;;  %s991_s19 = sadd.s32 4294967294, %s1328_s17   ;;  %s1328_s17 = sphi %s1368_s17, %s20_s17   ;;  %s1324_s16 = sphi %s1366_s16, %s1629_s16   ;;  %s1320_s15 = sphi %s1364_s15, %s1628_s15   ;;  %s1316_s14 = sphi %s1362_s14, %s1627_s14   ;;  %s1312_s13 = sphi %s1360_s13, %s1626_s13   ;;  %s1308_s12 = sphi %s1358_s12, %s1625_s12  }
   0x8   : > { %p98_p0 = scmp.ne.s32.totalorder %s1312_s13, %s1308_s12  ;;  %p1392_p1 = scmp.eq.s32.totalorder %s990_s18, 0 }
   0x9   : > { %p1396_p2 = scmp.eq.s32.totalorder %s990_s18, 2  ;;  %p160_p3 = scmp.eq.s32.totalorder %s991_s19, 2 }
   0xa   : > { %p1402_p4 = por %p1392_p1, %p98_p0  ;;  %p992_p5 = scmp.ge.s32.totalorder %s1328_s17, 1 }
   0xb   : > { %p1407_p6 = por %p160_p3, %p98_p0  ;;  %p167_p7 = scmp.lt.s32.totalorder %s1328_s17, 4 }
   0xc   : > { %s1330_s25 = smov [#allocation3]   ;;  %s46_s28 = sadd.s32 1, %s1324_s16 }
   0xd   : > { %s1615_s23 = scalar_select %p1407_p6, 1, 0 }
   0xe   : > { %p1412_p8 = pnand %p992_p5, %p167_p7  ;;  %s183_s26 = sshll.u32 %s1330_s25, 4  ;;  %s184_s26 = int_to_ptr.vmem [resolvable:$true] %s183_s26 }
   0xf   : > { %s1201_s29 = scalar_lea.vmem %s184_s26, 256  ;;  %p1209_p3 = scmp.lt.s32.totalorder %s184_s26, %s184_s26 }
  0x10   : > { %p1120_p9 = pneg %p1412_p8  ;;  %p1202_p12 = scmp.ne.s32.totalorder %s184_s26, %s1201_s29 }
  0x11   : > { %p1210_p5 = scmp.lt.s32.totalorder %s1201_s29, %s1201_s29 }
  0x12   : > { %p1420_p10 = pnand %p1120_p9, %p1392_p1 }
  0x13   : > { %p1211_p7 = por %p1210_p5, %p1209_p3 }
  0x14   : > { %p1192_p11 = pneg %p1420_p10 }
  0x16   : > { %p1204_p13 = pnand %p1202_p12, %p1192_p11 }
  0x18   : > { %p1205_p0 = pneg %p1204_p13 }
  0x1a   : > { %p1212_p6 = pnand %p1211_p7, %p1205_p0 }
  0x1c   : > { %1215 = shalt.err (!%p1212_p6)
}
  0x1d   : > { %s1609_s30 = smov 128   ;;  %s1610_s4 = smov 8  }
  0x1e   : > { %1123 = dma.hbm_to_vmem [thread:$0]  (!%p1420_p10), %s1605_s0, 256, %s184_s26, [#allocation4], %s1609_s30, %s1609_s30, %s1610_s4  }
  0x1f   : > { %p48_p6 = scmp.ge.s32.totalorder %s46_s28, 3  ;;  %s85_s7 = sadd.s32 1, %s1316_s14 }
  0x20   : > { %p92_p9 = scmp.ne.s32.totalorder %s1316_s14, %s1312_s13  ;;  %p93_p11 = scmp.eq.s32.totalorder %s1328_s17, 0 }
  0x21   : > { %s1631_s28 = smov (%p48_p6, %s46_s28), 0  ;;  %p1133_p0 = scmp.lt.s32.totalorder %s1328_s17, 3 }
  0x22   : > { %p1441_p12 = por %p93_p11, %p92_p9  ;;  %p1447_p13 = por %p1396_p2, %p92_p9 }
  0x23   : > { %s78_s10 = ssub.s32 %s1324_s16, %s1631_s28  ;;  %s197_s11 = sand.u32 1, %s1316_s14  }
  0x24   : > { %s1619_s9 = scalar_select %p1447_p13, 1, 0 }
  0x25   : > { %p83_p10 = scmp.eq.s32.totalorder %s78_s10, 0  ;;  %s995_s18 = sshll.u32 %s197_s11, 5 }
  0x26   : > { %s1008_s25 = sshll.u32 %s1324_s16, 9  ;;  %s201_s5 = scalar_lea.vmem [#allocation6], %s995_s18 }
  0x27   : > { %s1456_s19 = scalar_select %p83_p10, %s1316_s14, %s85_s7  }
  0x28   : > { %s210_s29 = scalar_lea.hbm %s1606_s1, %s1008_s25  ;;  %s211_s6 = sshll.u32 %s201_s5, 4  ;;  %s212_s6 = int_to_ptr.vmem [resolvable:$true] %s211_s6 }
  0x29   : > { %p1464_p2 = pnand %p1133_p0, %p1441_p12  ;;  %s198_s30 = scalar_lea.sflag [#allocation7], %s197_s11 }
  0x2a   : > { %s1229_s10 = scalar_lea.vmem %s212_s6, 512  ;;  %s1333_s7 = smov [#allocation6]  }
  0x2b   : > { %p1218_p3 = pneg %p1464_p2  ;;  %p1230_p5 = scmp.ne.s32.totalorder %s212_s6, %s1229_s10 }
  0x2c   : > { %s1234_s4 = sshll.u32 %s1333_s7, 4  ;;  %s1235_s4 = int_to_ptr.vmem [resolvable:$false] %s1234_s4 }
  0x2d   : > { %p1232_p7 = pnand %p1230_p5, %p1218_p3  ;;  %s1236_s25 = scalar_lea.vmem %s1235_s4, 1024 }
  0x2e   : > { %p1237_p9 = scmp.lt.s32.totalorder %s212_s6, %s1235_s4  ;;  %p1238_p11 = scmp.lt.s32.totalorder %s1236_s25, %s1229_s10 }
  0x2f   : > { %p1233_p6 = pneg %p1232_p7 }
  0x30   : > { %p1239_p10 = por %p1238_p11, %p1237_p9 }
  0x32   : > { %p1240_p13 = pnand %p1239_p10, %p1233_p6 }
  0x34   : > { %1243 = shalt.err (!%p1240_p13)
}
  0x35   : > { %s1621_s8 = smov 8   ;;  %s1622_s18 = smov 128  }
  0x36   : > { %1127 = dma.hbm_to_vmem [thread:$0]  (!%p1464_p2), %s210_s29, 512, %s212_s6, %s198_s30, %s1622_s18, %s1622_s18, %s1621_s8  }
  0x37   : > { %232 = sbr.rel (%p1412_p8) target bundleno = 327 (0x147), region = 32 }
  0x3c   : > { %1295 = dma.done.wait (%p1392_p1), [#allocation4], 256  }
  0x3d   : > { %1297 = vsyncadd (%p1392_p1), [#allocation4], 4294967040  ;;  %s1482_s4 = sand.u32 1, %s1312_s13  }
  0x3e   : > { %s1000_s11 = sshll.u32 %s1482_s4, 5  ;;  %s239_s26 = scalar_lea.sflag [#allocation7], %s1482_s4 }
  0x3f   : > { %s242_s27 = scalar_lea.vmem [#allocation6], %s1000_s11 }
  0x40   : > { %1299 = dma.done.wait (%p1402_p4), %s239_s26, 512  }
  0x41   : > { %1301 = vsyncadd (%p1402_p4), %s239_s26, 4294966784  ;;  %vm284_vm0 = vcmask 261120   ;;  %v294_v0 = vld [vmem:[%s242_s27 + $0x18] sm:$0xff]  ;;  %v293_v1 = vld [vmem:[%s242_s27 + $0x10] sm:$0xff]  ;;  %v1334_v38 = vmov 0.0   ;;  %p273_p1 = scmp.lt.s32.totalorder %s1320_s15, 2 }
  0x42   : > { %v292_v2 = vld [vmem:[%s242_s27 + $0x8] sm:$0xff]  ;;  %v1490_v3 = vand.u32 4294901760, %v294_v0  ;;  %v1492_v4 = vand.u32 4294901760, %v293_v1  ;;  %v291_v6 = vld [vmem:[%s242_s27] sm:$0xff]  ;;  %v289_v7 = vld [vmem:[#allocation3] sm:$0xff]  ;;  %286 = vst.msk [vmem:[#allocation2 + $0x8] sm:$0xff] %vm284_vm0, %v1334_v38 }
  0x43   : > { %v1494_v5 = vand.u32 4294901760, %v292_v2  ;;  %v290_v8 = vld [vmem:[#allocation3 + $0x8] sm:$0xff]  ;;  %v1496_v9 = vand.u32 4294901760, %v291_v6  ;;  %v297_v10 = vsel %vm284_vm0, %v289_v7, 0  ;;  %285 = vst.msk [vmem:[#allocation2] sm:$0xff] %vm284_vm0, %v1334_v38  ;;  %s274_s20 = scalar_select %p273_p1, %s1320_s15, 2 }
  0x44   : > { %v300_v11 = vsel %vm284_vm0, %v290_v8, 0  ;;  %1046 = vmatprep.subr.mxu0 %v1490_v3  ;;  %v417_v12 = vsub.f32 %v294_v0, %v1490_v3  ;;  %v1502_v13 = vand.u32 4294901760, %v297_v10  ;;  %v424_v14 = vsub.f32 %v293_v1, %v1492_v4  ;;  %s1001_s22 = sshll.u32 %s1482_s4, 4  ;;  %s1009_s5 = sshll.u32 %s1320_s15, 8 }
  0x45   : > { %v1505_v15 = vand.u32 4294901760, %v300_v11  ;;  %1047 = vmatpush3.msra.mxu0 %v1490_v3  ;;  %v431_v16 = vsub.f32 %v292_v2, %v1494_v5  ;;  %v438_v17 = vsub.f32 %v291_v6, %v1496_v9  ;;  %s278_s29 = scalar_lea.vmem %s1607_s2, %s274_s20  ;;  %s270_s6 = scalar_lea.vmem [#allocation8], %s1001_s22 }
  0x46   : > { %1048 = vmatprep.subr.mxu0 %v1492_v4  ;;  %v418_v18 = vand.u32 4294901760, %v417_v12  ;;  %v372_v19 = vsub.f32 %v297_v10, %v1502_v13  ;;  %v425_v20 = vand.u32 4294901760, %v424_v14  ;;  %1065 = vmatprep.mubr.f32.mxu1 %v1502_v13  ;;  %v1002_v1 = vld [vmem:[%s278_s29] ss:$0 sm:$0xff]  ;;  %s867_s21 = sshll.u32 %s270_s6, 4  ;;  %s1554_s25 = scalar_lea.hbm %s1608_s3, %s1009_s5  ;;  %s1556_s21 = int_to_ptr.vmem [resolvable:$true] %s867_s21 }
  0x47   : > { %v382_v21 = vsub.f32 %v300_v11, %v1505_v15  ;;  %1049 = vmatpush3.msra.mxu0 %v1492_v4  ;;  %v432_v22 = vand.u32 4294901760, %v431_v16  ;;  %v439_v23 = vand.u32 4294901760, %v438_v17  ;;  %s851_s15 = scalar_lea.sflag [#allocation5], %s1482_s4  ;;  %s1244_s8 = scalar_lea.vmem %s1556_s21, 256 }
  0x48   : > { %1050 = vmatprep.subr.mxu0 %v1494_v5  ;;  %v419_v24 = vsub.f32 %v417_v12, %v418_v18  ;;  %v373_v25 = vand.u32 4294901760, %v372_v19  ;;  %v426_v26 = vsub.f32 %v424_v14, %v425_v20  ;;  %p1245_p4 = scmp.ne.s32.totalorder %s1556_s21, %s1244_s8  ;;  %p1623_p8 = scmp.ne.s32.totalorder %s1619_s9, 0 }
  0x49   : > { %v383_v27 = vand.u32 4294901760, %v382_v21  ;;  %1051 = vmatpush3.msra.mxu0 %v1494_v5  ;;  %v433_v28 = vsub.f32 %v431_v16, %v432_v22  ;;  %v440_v29 = vsub.f32 %v438_v17, %v439_v23  ;;  %v288_v56 = vld [vmem:[#allocation2 + $0x8] sm:$0xff]  ;;  %s1335_s18 = smov [#allocation8]  }
  0x4a   : > { %1052 = vmatprep.subr.mxu0 %v1496_v9  ;;  %v420_v30 = vand.u32 4294901760, %v419_v24  ;;  %v374_v31 = vsub.f32 %v372_v19, %v373_v25  ;;  %v427_v32 = vand.u32 4294901760, %v426_v26  ;;  %v287_v60 = vld [vmem:[#allocation2] sm:$0xff]  ;;  %p1246_p12 = pnand %p1245_p4, %p1623_p8  ;;  %s1248_s11 = sshll.u32 %s1335_s18, 4  ;;  %s1249_s11 = int_to_ptr.vmem [resolvable:$false] %s1248_s11 }
  0x4b   : > { %v384_v33 = vsub.f32 %v382_v21, %v383_v27  ;;  %1053 = vmatpush3.msra.mxu0 %v1496_v9  ;;  %v434_v36 = vand.u32 4294901760, %v433_v28  ;;  %v441_v37 = vand.u32 4294901760, %v440_v29  ;;  %s1250_s26 = scalar_lea.vmem %s1249_s11, 512  ;;  %p1251_p0 = scmp.lt.s32.totalorder %s1556_s21, %s1249_s11 }
  0x4c   : > { %1057 = vmatprep.subr.mxu1 %v420_v30  ;;  %v375_v34 = vand.u32 4294901760, %v374_v31  ;;  %1068 = vmatprep.subr.mxu0 %v417_v12  ;;  %p1247_p13 = pneg %p1246_p12  ;;  %p1252_p2 = scmp.lt.s32.totalorder %s1250_s26, %s1244_s8 }
  0x4d   : > { %v385_v35 = vand.u32 4294901760, %v384_v33  ;;  %1058 = vmatpush3.msra.mxu1 %v420_v30 }
  0x4e   : > { %1054 = vmatprep.mubr.f32.mxu0 %v375_v34  ;;  %1059 = vmatprep.subr.mxu1 %v427_v32  ;;  %p1253_p3 = por %p1252_p2, %p1251_p0 }
  0x4f   : > { %1055 = vmatmul.mubr.f32.vlgmr.msra.gmra.mxu0 %v385_v35  ;;  %1060 = vmatpush3.msra.mxu1 %v427_v32 }
  0x50   : > { %1069 = vmatpush3.msra.mxu0 %v417_v12  ;;  %1061 = vmatprep.subr.mxu1 %v434_v36  ;;  %p1254_p5 = pnand %p1253_p3, %p1247_p13 }
  0x51   : > { %1070 = vmatprep.subr.mxu0 %v424_v14  ;;  %1062 = vmatpush3.msra.mxu1 %v434_v36 }
  0x52   : > { %1071 = vmatpush3.msra.mxu0 %v424_v14  ;;  %1063 = vmatprep.subr.mxu1 %v441_v37 }
  0x53   : > { %1072 = vmatprep.subr.mxu0 %v431_v16  ;;  %1064 = vmatpush3.msra.mxu1 %v441_v37 }
  0x54   : > { %1073 = vmatpush3.msra.mxu0 %v431_v16  ;;  %1066 = vmatmul.mubr.f32.vlgmr.msra.gmra.mxu1 %v1505_v15 }
  0x55   : > { %1074 = vmatprep.subr.mxu0 %v438_v17  ;;  %1079 = vmatprep.subr.mxu1 %v1490_v3 }
  0x56   : > { %1075 = vmatpush3.msra.mxu0 %v438_v17  ;;  %1076 = vmatprep.mubr.f32.mxu0 %v372_v19 }
  0x57   : > { %1080 = vmatpush3.msra.mxu1 %v1490_v3  ;;  %1077 = vmatmul.mubr.f32.vlgmr.msra.gmra.mxu0 %v382_v21 }
  0x58   : > { %1081 = vmatprep.subr.mxu1 %v1492_v4  ;;  %1090 = vmatprep.subr.mxu0 %v418_v18 }
  0x59   : > { %1082 = vmatpush3.msra.mxu1 %v1492_v4  ;;  %1091 = vmatpush3.msra.mxu0 %v418_v18 }
  0x5a   : > { %1083 = vmatprep.subr.mxu1 %v1494_v5  ;;  %1092 = vmatprep.subr.mxu0 %v425_v20 }
  0x5b   : > { %1084 = vmatpush3.msra.mxu1 %v1494_v5  ;;  %1093 = vmatpush3.msra.mxu0 %v425_v20 }
  0x5c   : > { %1085 = vmatprep.subr.mxu1 %v1496_v9  ;;  %1094 = vmatprep.subr.mxu0 %v432_v22 }
  0x5d   : > { %1086 = vmatpush3.msra.mxu1 %v1496_v9  ;;  %1087 = vmatprep.mubr.f32.mxu1 %v373_v25 }
  0x5e   : > { %1095 = vmatpush3.msra.mxu0 %v432_v22  ;;  %1088 = vmatmul.mubr.f32.vlgmr.msra.gmra.mxu1 %v383_v27 }
  0x5f   : > { %1096 = vmatprep.subr.mxu0 %v439_v23  ;;  %1101 = vmatprep.subr.mxu1 %v1490_v3 }
  0x60   : > { %1097 = vmatpush3.msra.mxu0 %v439_v23  ;;  %1098 = vmatprep.mubr.f32.mxu0 %v1502_v13 }
  0x61   : > { %1102 = vmatpush3.msra.mxu1 %v1490_v3  ;;  %1099 = vmatmul.mubr.f32.vlgmr.msra.gmra.mxu0 %v1505_v15 }
  0x62   : > { %1103 = vmatprep.subr.mxu1 %v1492_v4  ;;  %1109 = vmatprep.mubr.f32.mxu1 %v1502_v13 }
  0x63   : > { %1104 = vmatpush3.msra.mxu1 %v1492_v4 }
  0x64   : > { %1105 = vmatprep.subr.mxu1 %v1494_v5 }
  0x65   : > { %1106 = vmatpush3.msra.mxu1 %v1494_v5 }
  0x66   : > { %1107 = vmatprep.subr.mxu1 %v1496_v9 }
  0x67   : > { %1108 = vmatpush3.msra.mxu1 %v1496_v9 }
  0x68   : > { %1110 = vmatmul.mubr.f32.vlgmr.msra.gmra.mxu1 %v1505_v15 }
 0x10f   : > { %v1056_v39 = vpop.f32.mrf.mxu0 }
 0x111   : > { %v377_v40 = vpop.f32.mrf.mxu0 }
 0x114   : > { %v1067_v41 = vpop.f32.mrf.mxu1 }
 0x115   : > { %v485_v44 = vadd.f32 %v1067_v41, %v1056_v39 }
 0x116   : > { %v478_v42 = vpop.f32.mrf.mxu1 }
 0x117   : > { %v1078_v43 = vpop.f32.mrf.mxu0  ;;  %v479_v46 = vadd.f32 %v478_v42, %v377_v40 }
 0x118   : > { %v572_v48 = vadd.f32 %v1078_v43, %v485_v44 }
 0x119   : > { %v564_v47 = vpop.f32.mrf.mxu0 }
 0x11a   : > { %v565_v51 = vadd.f32 %v564_v47, %v479_v46 }
 0x11e   : > { %v1089_v45 = vpop.f32.mrf.mxu1 }
 0x11f   : > { %v657_v52 = vadd.f32 %v1089_v45, %v572_v48 }
 0x120   : > { %v648_v49 = vpop.f32.mrf.mxu1 }
 0x121   : > { %v1100_v50 = vpop.f32.mrf.mxu0  ;;  %v649_v53 = vadd.f32 %v648_v49, %v565_v51 }
 0x122   : > { %v746_v55 = vadd.f32 %v1100_v50, %v657_v52 }
 0x123   : > { %v739_v54 = vpop.f32.mrf.mxu0 }
 0x124   : > { %v740_v58 = vadd.f32 %v739_v54, %v649_v53 }
 0x128   : > { %v1111_v57 = vpop.f32.mrf.mxu1 }
 0x129   : > { %v827_v59 = vadd.f32 %v1111_v57, %v746_v55 }
 0x12a   : > { %v820_v61 = vpop.f32.mrf.mxu1 }
 0x12b   : > { %v831_v62 = vadd.f32 %v827_v59, %v288_v56  ;;  %v821_v63 = vadd.f32 %v820_v61, %v740_v58 }
 0x12d   : > { %833 = vst.msk [vmem:[#allocation2 + $0x8] sm:$0xff] %vm284_vm0, %v831_v62  ;;  %v830_v0 = vadd.f32 %v821_v63, %v287_v60 }
 0x12f   : > { %832 = vst.msk [vmem:[#allocation2] sm:$0xff] %vm284_vm0, %v830_v0 }
 0x134   : > { %v838_v2 = vld [vmem:[#allocation2 + $0x8] sm:$0xff] }
 0x135   : > { %v847_v3 = vadd.f32 %v1002_v1, %v838_v2 }
 0x136   : > { %v837_v4 = vld [vmem:[#allocation2] sm:$0xff] }
 0x137   : > { %v846_v5 = vadd.f32 %v1002_v1, %v837_v4  ;;  %849 = vst.msk [vmem:[%s270_s6 + $0x8] sm:$0xff] %vm284_vm0, %v847_v3 }
 0x139   : > { %848 = vst.msk [vmem:[%s270_s6] sm:$0xff] %vm284_vm0, %v846_v5 }
 0x13a   : > { %1257 = shalt.err (!%p1254_p5)
}
 0x13b   : > { %s1258_s27 = scalar_lea.hbm %s1554_s25, 256  ;;  %s1262_s24 = scalar_lea.hbm %s1608_s3, 768 }
 0x13c   : > { %p1259_p7 = scmp.ne.s32.totalorder %s1554_s25, %s1258_s27  ;;  %p1263_p11 = scmp.lt.s32.totalorder %s1554_s25, %s1608_s3 }
 0x13d   : > { %p1264_p10 = scmp.lt.s32.totalorder %s1262_s24, %s1258_s27 }
 0x13e   : > { %p1260_p6 = pnand %p1259_p7, %p1623_p8 }
 0x13f   : > { %p1265_p1 = por %p1264_p10, %p1263_p11 }
 0x140   : > { %p1261_p9 = pneg %p1260_p6 }
 0x142   : > { %p1266_p4 = pnand %p1265_p1, %p1261_p9 }
 0x144   : > { %1269 = shalt.err (!%p1266_p4)
}
 0x145   : > { %s1336_s5 = smov 128   ;;  %s1337_s6 = smov 8  }
 0x146   : > { %1118 = dma.vmem_to_hbm [thread:$0]  (%p1623_p8), %s1556_s21, 256, %s1554_s25, %s851_s15, %s1336_s5, %s1336_s5, %s1337_s6  }
 0x147 PF: > { %p1135_p12 = scmp.ge.s32.totalorder %s1328_s17, 2  ;;  %s882_s10 = sand.u32 1, %s1308_s12  }
 0x148   : > { %p1624_p13 = scmp.ne.s32.totalorder %s1615_s23, 0  ;;  %s883_s7 = scalar_lea.sflag [#allocation5], %s882_s10 }
 0x14a   : > { %p1129_p0 = pnand %p1135_p12, %p1624_p13 }
 0x14c   : > { %p1130_p2 = pneg %p1129_p0 }
 0x14e   : > { %1303 = dma.done.wait (%p1130_p2), %s883_s7, 256  }
 0x14f   : > { %1305 = vsyncadd (%p1130_p2), %s883_s7, 4294967040  ;;  %s20_s17 = sadd.s32 1, %s1328_s17   ;;  %s1625_s12 = smov %s1312_s13 }
 0x150   : > { %p17_p3 = scmp.ge.s32.totalorder %s20_s17, 5   ;;  %s1626_s13 = smov %s1316_s14 }
 0x151   : > { %s1627_s14 = smov %s1456_s19  ;;  %s1628_s15 = smov %s1324_s16 }
 0x152   : > { %s1629_s16 = smov %s1631_s28  ;;  %19 = sbr.rel (!%p17_p3) target bundleno = 7 (0x7), region = 94 }
 0x157   :  { %888 = vsyncpa [#allocation4], 1 }
 0x158   :  { %890 = vsyncpa [#allocation4 + $0x1], 1 }
 0x159   :  { %891 = vsyncpa [#allocation7], 1 }
 0x15a   :  { %893 = vsyncpa [#allocation7 + $0x1], 1 }
 0x15b   :  { %894 = vsyncpa [#allocation5], 1 }
 0x15c   :  { %896 = vsyncpa [#allocation5 + $0x1], 1 }

</bundles_post_ra>
